<compile_context>
chip_gen: v7x
topology: tpu7x:2x2x1
jax: 0.10.0
libtpu: 0.0.40
codegen_flags: <defaults>
</compile_context>

<pallas_src>
import math
import random
from enum import Enum
from functools import partial

import jax
import jax.numpy as jnp
from jax import lax
from jax.experimental import pallas as pl
from jax.experimental.pallas import tpu as pltpu


class RollDimension(Enum):
    TIME = 2
    FREQUENCY = 1


_TARGET_TILE_BYTES = 2 * 1024 * 1024   # ~2 MiB/block -> 2 arrays x 2 bufs ~= 8 MiB
_VMEM_LIMIT_BYTES = 32 * 1024 * 1024   # fits v5e/v6e (128 MiB) and v7x (64 MiB)
_MAX_PERM_DIM = 512                    # cap for the one-hot permutation matmul path


def _ceil_to(x, m):
    return ((x + m - 1) // m) * m


def _floor_to(x, m):
    return (x // m) * m


def _sublane_pack(itemsize):
    # Packed sublane count: 8 for 4-byte, 16 for 2-byte, 32 for 1-byte dtypes.
    return 8 * max(1, 4 // itemsize)


# ---------------------------------------------------------------------------
# Kernel 1: roll along the lane (last) axis.
# ---------------------------------------------------------------------------
def _roll_lanes_kernel(shift_ref, x_ref, o_ref):
    # x_ref / o_ref: (rb, T) VMEM tiles; rotate along the lane axis (XLU).
    o_ref[...] = pltpu.roll(x_ref[...], shift_ref[0], axis=1)


def _roll_lanes(x2, shift_arr):
    """Roll every row of x2 (N, T) along the last axis by shift_arr[0]."""
    n, t = x2.shape
    itemsize = x2.dtype.itemsize
    pack = _sublane_pack(itemsize)

    # Row block from the VMEM budget, sublane-pack aligned; keep >= 2 grid
    # steps when possible so both v7x TensorCores get work; cdiv handles
    # ragged row counts with a padded last block (padding is only in the row
    # dim, so the lane rotate of valid rows is unaffected).
    rb = _floor_to(max(pack, _TARGET_TILE_BYTES // max(1, t * itemsize)), pack)
    rb = min(rb, max(pack, _ceil_to(pl.cdiv(n, 2), pack)))
    rb = min(rb, _ceil_to(n, pack))
    # TODO(synk): if a single packed row group (pack * T * itemsize) exceeds
    # VMEM (extremely long roll axes), T must be split with a carried wrap.

    grid = (pl.cdiv(n, rb),)
    return pl.pallas_call(
        _roll_lanes_kernel,
        out_shape=jax.ShapeDtypeStruct((n, t), x2.dtype),
        grid_spec=pltpu.PrefetchScalarGridSpec(
            num_scalar_prefetch=1,
            grid=grid,
            in_specs=[pl.BlockSpec((rb, t), lambda i, s: (i, 0))],
            out_specs=pl.BlockSpec((rb, t), lambda i, s: (i, 0)),
        ),
        compiler_params=pltpu.CompilerParams(
            dimension_semantics=("parallel",),
            vmem_limit_bytes=_VMEM_LIMIT_BYTES,
        ),
    )(shift_arr, x2)


# ---------------------------------------------------------------------------
# Kernel 2: roll along the sublane (second-to-last) axis in native layout.
# ---------------------------------------------------------------------------
def _roll_sublanes_kernel(shift_ref, x_ref, o_ref):
    # x_ref / o_ref: (R, tl) tile with the roll extent R on sublanes.
    # out[i, :] = x[(i - s) % R, :], computed as a one-hot permutation matmul
    # on the MXU (exact for finite inputs; avoids any HBM transpose).
    # TODO(synk): switch to a native dynamic sublane rotate (pltpu.roll,
    # axis=-2) if/when Mosaic supports a dynamic shift on the sublane dim.
    r = x_ref.shape[0]
    s = shift_ref[0]
    rows = lax.broadcasted_iota(jnp.int32, (r, r), 0)
    cols = lax.broadcasted_iota(jnp.int32, (r, r), 1)
    d = cols - rows + s                          # one-hot iff d in {0, r}
    perm = jnp.where(jnp.logical_or(d == 0, d == r),
                     jnp.float32(1.0), jnp.float32(0.0))
    y = jnp.dot(perm, x_ref[...].astype(jnp.float32),
                preferred_element_type=jnp.float32,
                precision=lax.Precision.HIGHEST)
    o_ref[...] = y.astype(o_ref.dtype)


def _roll_sublanes(x3, shift_arr):
    """Roll x3 (pre, R, post) along axis 1 by shift_arr[0], native layout."""
    pre, r, post = x3.shape
    itemsize = x3.dtype.itemsize
    tl = _floor_to(max(128, _TARGET_TILE_BYTES // max(1, r * itemsize)), 128)
    tl = post if tl >= post else tl              # full extent if it fits
    grid = (pre, pl.cdiv(post, tl))
    return pl.pallas_call(
        _roll_sublanes_kernel,
        out_shape=jax.ShapeDtypeStruct((pre, r, post), x3.dtype),
        grid_spec=pltpu.PrefetchScalarGridSpec(
            num_scalar_prefetch=1,
            grid=grid,
            in_specs=[pl.BlockSpec((None, r, tl), lambda b, j, s: (b, 0, j))],
            out_specs=pl.BlockSpec((None, r, tl), lambda b, j, s: (b, 0, j)),
        ),
        compiler_params=pltpu.CompilerParams(
            dimension_semantics=("parallel", "parallel"),
            vmem_limit_bytes=_VMEM_LIMIT_BYTES,
        ),
    )(shift_arr, x3)


# ---------------------------------------------------------------------------
# Jitted dispatcher + module wrapper.
# ---------------------------------------------------------------------------
@partial(jax.jit, static_argnums=(2,))
def _roll_and_wrap_impl(x, shift, dim):
    dim = dim % x.ndim
    size = x.shape[dim]
    s = jnp.reshape(shift.astype(jnp.int32) % size, (1,))   # normalize in-graph

    if dim == x.ndim - 1:
        # Roll axis is already the lane axis: free reshape + lane rotate.
        out2 = _roll_lanes(x.reshape((-1, size)), s)
        return out2.reshape(x.shape)

    pre = math.prod(x.shape[:dim])
    post = math.prod(x.shape[dim + 1:])
    if jnp.issubdtype(x.dtype, jnp.floating) and size <= _MAX_PERM_DIM:
        # Native layout: collapse leading/trailing dims (free), roll on sublanes.
        out3 = _roll_sublanes(x.reshape((pre, size, post)), s)
        return out3.reshape(x.shape)

    # Fallback (non-float dtypes / very large roll extents): HBM transpose
    # round-trip + lane rotate.
    xm = jnp.moveaxis(x, dim, -1)
    out2 = _roll_lanes(xm.reshape((-1, size)), s)
    return jnp.moveaxis(out2.reshape(xm.shape), -1, dim)


def roll_and_wrap_apply(x, shift, dim):
    """Equivalent of torch.roll(x, shifts=shift, dims=dim)."""
    return _roll_and_wrap_impl(x, jnp.asarray(shift, dtype=jnp.int32), int(dim))


class RollAndWrap:
    """JAX/Pallas port of the PyTorch RollAndWrap module."""

    def __init__(self, max_shift, dim, min_shift=None):
        self.max_shift = max_shift
        self.min_shift = -max_shift if min_shift is None else min_shift
        self.dim = dim.value if isinstance(dim, RollDimension) else dim
        # Deterministic host-side RNG (PyTorch version uses `random.randint`).
        self._rng = random.Random(0)
        self.last_shift = None

    def __call__(self, tensor):
        shift = self._rng.randint(self.min_shift, self.max_shift)
        self.last_shift = shift
        return roll_and_wrap_apply(tensor, shift, self.dim)


if __name__ == "__main__":
    key = jax.random.PRNGKey(0)
    # Spectrogram-like input: (batch, freq, time)
    B, F, T = 2, 64, 256
    x = jax.random.normal(key, (B, F, T), dtype=jnp.float32)

    # TIME (last-dim) roll: lane-rotate kernel with large row tiles.
    mod_t = RollAndWrap(max_shift=10, dim=RollDimension.TIME)
    out_t = jax.block_until_ready(mod_t(x))
    ref_t = jnp.roll(x, mod_t.last_shift, axis=2)
    assert out_t.shape == x.shape and out_t.dtype == x.dtype
    assert bool(jnp.array_equal(out_t, ref_t)), "TIME roll mismatch vs jnp.roll"

    # FREQUENCY (non-last-dim) roll: native-layout sublane-permutation kernel.
    mod_f = RollAndWrap(max_shift=5, dim=RollDimension.FREQUENCY)
    out_f = jax.block_until_ready(mod_f(x))
    ref_f = jnp.roll(x, mod_f.last_shift, axis=1)
    assert out_f.shape == x.shape and out_f.dtype == x.dtype
    assert bool(jnp.allclose(out_f, ref_f, rtol=1e-6, atol=1e-6)), \
        "FREQUENCY roll mismatch vs jnp.roll"

    # Ragged row count (15 rows, not a multiple of 8): exercises the cdiv grid
    # with a padded last block on the lane-roll path.
    y = jax.random.normal(jax.random.PRNGKey(1), (3, 5, 384), dtype=jnp.float32)
    mod_r = RollAndWrap(max_shift=200, dim=-1)
    out_r = jax.block_until_ready(mod_r(y))
    ref_r = jnp.roll(y, mod_r.last_shift, axis=-1)
    assert bool(jnp.array_equal(out_r, ref_r)), "ragged roll mismatch vs jnp.roll"

    print("KERNEL_OK")
</pallas_src>

<mosaic_0001>
module attributes {stable_mosaic.version = 11 : i64} {
  func.func @_roll_lanes_kernel(%arg0: i32, %arg1: memref<1xi32, #tpu.memory_space<smem>>, %arg2: memref<64x256xf32, #tpu.memory_space<vmem>>, %arg3: memref<64x256xf32, #tpu.memory_space<vmem>>) attributes {dimension_semantics = [#tpu.dimension_semantics<parallel>], iteration_bounds = array<i64: 2>, scalar_prefetch = 1 : i64, scratch_operands = 0 : i64, tpu.core_type = #tpu.core_type<tc>, window_params = [{transform_indices = @transform_0, window_bounds = array<i64: 64, 256>}, {transform_indices = @transform_1, window_bounds = array<i64: 64, 256>}]} {
    %c0 = arith.constant 0 : index
    %c0_0 = arith.constant 0 : index
    %0 = vector.load %arg2[%c0, %c0_0] : memref<64x256xf32, #tpu.memory_space<vmem>>, vector<64x256xf32>
    %c0_1 = arith.constant 0 : index
    %1 = memref.load %arg1[%c0_1] : memref<1xi32, #tpu.memory_space<smem>>
    %2 = tpu.dynamic_rotate %0 by %1 dim 1 : vector<64x256xf32>, i32 -> vector<64x256xf32>
    %c0_2 = arith.constant 0 : index
    %c0_3 = arith.constant 0 : index
    %3 = vector.load %arg3[%c0_2, %c0_3] : memref<64x256xf32, #tpu.memory_space<vmem>>, vector<64x256xf32>
    tpu.vector_store %arg3[%c0_2, %c0_3], %2 {strides = array<i32>} : memref<64x256xf32, #tpu.memory_space<vmem>>, vector<64x256xf32>,
    return
  }
  func.func @transform_0(%arg0: i32, %arg1: memref<1xi32, #tpu.memory_space<smem>>) -> (i32, i32) {
    %c0_i32 = arith.constant 0 : i32
    %c0_i32_0 = arith.constant 0 : i32
    return %arg0, %c0_i32 : i32, i32
  }
  func.func @transform_1(%arg0: i32, %arg1: memref<1xi32, #tpu.memory_space<smem>>) -> (i32, i32) {
    %c0_i32 = arith.constant 0 : i32
    %c0_i32_0 = arith.constant 0 : i32
    return %arg0, %c0_i32 : i32, i32
  }
}

</mosaic_0001>

<bundles_post_ra>
// kernel: _roll_and_wrap_impl.1
= control target key start
LH: loop header
LB: loop body
LE: loop exit
PB: predicated region body
PF: predicated region fallthrough
CT: control target
= control target key end

     0   :  { %s808_s0 = inlined_call_operand.<no memory space> [shape: s32[1], index: 0, kind: input, shape index: {}]   ;;  %s809_s1 = inlined_call_operand.hbm [shape: f32[128,256], index: 1, kind: input, shape index: {}]   ;;  %s810_s2 = inlined_call_operand.hbm [shape: f32[128,256], index: 2, kind: output, shape index: {}]  }
   0x1   :  { %7 = sst [smem:[#allocation3]] %s808_s0 }
   0x2   :  { %8 = vsyncpa [#allocation5], 0 }
   0x3   :  { %10 = vsyncpa [#allocation5 + $0x1], 0 }
   0x4   :  { %11 = vsyncpa [#allocation6], 0 }
   0x5   :  { %13 = vsyncpa [#allocation6 + $0x1], 0  ;;  %s527_s11 = smov 0   ;;  %s529_s12 = smov 0  }
   0x6   :  { %s531_s13 = smov 0   ;;  %s533_s14 = smov 0  }
   0x7 LB: > { %s548_s0 = sadd.s32 4294967295, %s501_s14   ;;  %s335_s15 = sadd.s32 4294967294, %s501_s14   ;;  %s501_s14 = sphi %s533_s14, %s825_s14   ;;  %s497_s13 = sphi %s531_s13, %s824_s13   ;;  %s493_s12 = sphi %s529_s12, %s823_s12   ;;  %s489_s11 = sphi %s527_s11, %s822_s11  }
   0x8   : > { %s552_s16 = sadd.s32 1, %s501_s14   ;;  %s26_s17 = sadd.s32 1, %s497_s13 }
   0x9   : > { %s23_s18 = ssub.s32 %s501_s14, %s552_s16  ;;  %p33_p0 = scmp.ne.s32.totalorder %s497_s13, %s493_s12 }
   0xa   : > { %p24_p1 = scmp.eq.s32.totalorder %s23_s18, 0  ;;  %p34_p2 = scmp.eq.s32.totalorder %s501_s14, 0 }
   0xb   : > { %p39_p3 = scmp.ne.s32.totalorder %s493_s12, %s489_s11  ;;  %p40_p4 = scmp.eq.s32.totalorder %s548_s0, 0 }
   0xc   : > { %s564_s19 = scalar_select %p24_p1, %s497_s13, %s26_s17  }
   0xd   : > { %p566_p5 = por %p34_p2, %p33_p0  ;;  %p570_p6 = por %p40_p4, %p39_p3 }
   0xe   : > { %p63_p7 = scmp.eq.s32.totalorder %s548_s0, 1  ;;  %p69_p8 = scmp.eq.s32.totalorder %s335_s15, 1 }
   0xf   : > { %p367_p10 = scmp.lt.s32.totalorder %s501_s14, 2  ;;  %s89_s24 = sand.u32 1, %s497_s13  }
  0x10   : > { %p577_p11 = por %p63_p7, %p33_p0  ;;  %p581_p12 = por %p69_p8, %p39_p3 }
  0x11   : > { %s352_s25 = sshll.u32 %s501_s14, 11  ;;  %s338_s26 = sshll.u32 %s89_s24, 7 }
  0x12   : > { %s814_s22 = scalar_select %p577_p11, 1, 0 }
  0x13   : > { %s815_s23 = scalar_select %p581_p12, 1, 0 }
  0x14   : > { %s590_s29 = scalar_lea.hbm %s809_s1, %s352_s25  ;;  %s93_s30 = scalar_lea.vmem [#allocation4], %s338_s26 }
  0x15   : > { %s101_s3 = sshll.u32 %s93_s30, 4  ;;  %p594_p13 = pnand %p367_p10, %p566_p5  ;;  %s598_s3 = int_to_ptr.vmem [resolvable:$true] %s101_s3 }
  0x16   : > { %s600_s5 = scalar_lea.sflag [#allocation5], %s89_s24  ;;  %s405_s6 = scalar_lea.hbm %s590_s29, 2048 }
  0x17   : > { %p406_p0 = scmp.ne.s32.totalorder %s590_s29, %s405_s6  ;;  %p407_p1 = pneg %p594_p13 }
  0x18   : > { %s410_s9 = scalar_lea.hbm %s809_s1, 4096  ;;  %p411_p4 = scmp.lt.u32.totalorder %s590_s29, %s809_s1 }
  0x19   : > { %p408_p2 = pnand %p407_p1, %p406_p0  ;;  %p412_p5 = scmp.lt.u32.totalorder %s410_s9, %s405_s6 }
  0x1a   : > { %p414_p8 = scmp.lt.u32.totalorder %s405_s6, %s590_s29 }
  0x1b   : > { %p409_p3 = pneg %p408_p2  ;;  %p413_p7 = por %p412_p5, %p411_p4 }
  0x1d   : > { %p415_p10 = por %p414_p8, %p413_p7 }
  0x1f   : > { %p416_p9 = pnand %p415_p10, %p409_p3 }
  0x21   : > { %419 = shalt.err (!%p416_p9)
}
  0x22   : > { %s420_s17 = scalar_lea.vmem %s598_s3, 2048  ;;  %s503_s18 = smov [#allocation4]  }
  0x23   : > { %p421_p0 = scmp.ne.s32.totalorder %s598_s3, %s420_s17  ;;  %s425_s20 = sshll.u32 %s503_s18, 4  ;;  %s426_s20 = int_to_ptr.vmem [resolvable:$false] %s425_s20 }
  0x24   : > { %s427_s24 = scalar_lea.vmem %s426_s20, 4096  ;;  %p428_p11 = scmp.lt.s32.totalorder %s598_s3, %s426_s20 }
  0x25   : > { %p423_p2 = pnand %p421_p0, %p407_p1  ;;  %p429_p4 = scmp.lt.s32.totalorder %s427_s24, %s420_s17 }
  0x27   : > { %p424_p12 = pneg %p423_p2  ;;  %p430_p5 = por %p429_p4, %p428_p11 }
  0x29   : > { %p431_p7 = pnand %p430_p5, %p424_p12 }
  0x2b   : > { %434 = shalt.err (!%p431_p7)
}
  0x2c   : > { %s504_s25 = smov 256   ;;  %s505_s26 = smov 16  }
  0x2d   : > { %362 = dma.hbm_to_vmem [thread:$0]  (!%p594_p13), %s590_s29, 2048, %s598_s3, %s600_s5, %s504_s25, %s504_s25, %s505_s26  }
  0x2e   : > { %p342_p9 = scmp.ge.s32.totalorder %s501_s14, 1  ;;  %p109_p1 = scmp.lt.s32.totalorder %s501_s14, 3 }
  0x30   : > { %p110_p3 = pnand %p342_p9, %p109_p1 }
  0x31   : > { %s631_s27 = sand.u32 (!%p110_p3), 1, %s493_s12  }
  0x32   : > { %113 = sbr.rel (%p110_p3) target bundleno = 227 (0xe3), region = 24  ;;  %s343_s28 = sshll.u32 (!%p110_p3), %s631_s27, 7 }
  0x33   : > { %s116_s30 = scalar_lea.sflag (!%p110_p3), [#allocation5], %s631_s27  ;;  %s637_s6 = scalar_lea.vmem (!%p110_p3), [#allocation4], %s343_s28 }
  0x39   : > { %480 = dma.done.wait (%p570_p6), %s116_s30, 2048  }
  0x3a   : > { %482 = vsyncadd (%p570_p6), %s116_s30, 4294965248  ;;  %s643_s29 = sld [smem:[#allocation3]]  ;;  %v144_v0 = vld [vmem:[%s637_s6 + $0x20] sm:$0xff]  ;;  %v146_v2 = vld [vmem:[%s637_s6 + $0x30] sm:$0xff]  ;;  %v193_v20 = vlaneseq  ;;  %s703_s7 = scalar_lea.vmem [#allocation7], %s343_s28 }
  0x3b   : > { %v140_v1 = vld [vmem:[%s637_s6] sm:$0xff]  ;;  %v142_v3 = vld [vmem:[%s637_s6 + $0x10] sm:$0xff]  ;;  %v143_v8 = vld [vmem:[%s637_s6 + $0x18] sm:$0xff]  ;;  %s354_s8 = sshll.u32 %s548_s0, 11  ;;  %s262_s9 = sshll.u32 %s703_s7, 4  ;;  %s748_s9 = int_to_ptr.vmem [resolvable:$true] %s262_s9 }
  0x3c   : > { %v150_v4 = vld [vmem:[%s637_s6 + $0x50] sm:$0xff]  ;;  %v148_v5 = vld [vmem:[%s637_s6 + $0x40] sm:$0xff]  ;;  %v141_v9 = vld [vmem:[%s637_s6 + $0x8] sm:$0xff]  ;;  %v194_v23 = vand.u32 127, %v193_v20  ;;  %s746_s15 = scalar_lea.hbm %s810_s2, %s354_s8  ;;  %s248_s17 = scalar_lea.sflag [#allocation6], %s631_s27 }
  0x3d   : > { %v154_v6 = vld [vmem:[%s637_s6 + $0x70] sm:$0xff]  ;;  %v152_v7 = vld [vmem:[%s637_s6 + $0x60] sm:$0xff]  ;;  %v147_v10 = vld [vmem:[%s637_s6 + $0x38] sm:$0xff]  ;;  %s435_s18 = scalar_lea.vmem %s748_s9, 2048  ;;  %p819_p11 = scmp.ne.s32.totalorder %s814_s22, 0 }
  0x3e   : > { %v145_v11 = vld [vmem:[%s637_s6 + $0x28] sm:$0xff]  ;;  %v151_v12 = vld [vmem:[%s637_s6 + $0x58] sm:$0xff]  ;;  %p436_p6 = scmp.ne.s32.totalorder %s748_s9, %s435_s18  ;;  %s506_s20 = smov [#allocation7]  }
  0x3f   : > { %v149_v13 = vld [vmem:[%s637_s6 + $0x48] sm:$0xff]  ;;  %v155_v14 = vld [vmem:[%s637_s6 + $0x78] sm:$0xff]  ;;  %s439_s24 = sshll.u32 %s506_s20, 4  ;;  %s440_s24 = int_to_ptr.vmem [resolvable:$false] %s439_s24 }
  0x40   : > { %s157_s3 = sand.u32 255, %s643_s29   ;;  %v153_v15 = vld [vmem:[%s637_s6 + $0x68] sm:$0xff]  ;;  %p437_p12 = pnand %p436_p6, %p819_p11 }
  0x41   : > { %s650_s4 = sand.u32 127, %s157_s3   ;;  %s159_s21 = sshrl.u32 %s157_s3, 7 }
  0x42   : > { %164 = vrot.lane.b32.xlu1 %v144_v0, %s650_s4  ;;  %160 = vrot.lane.b32.xlu0 %v140_v1, %s650_s4  ;;  %s212_s5 = sand.u32 1, %s159_s21  ;;  %v192_v24 = vstv %s650_s4  ;;  %p438_p13 = pneg %p437_p12 }
  0x43   : > { %v213_v27 = vstv %s212_s5  ;;  %vm685_vm0 = vcmp.lt.s32.totalorder %v194_v23, %v192_v24  ;;  %s441_s25 = scalar_lea.vmem %s440_s24, 4096  ;;  %p442_p8 = scmp.lt.s32.totalorder %s748_s9, %s440_s24 }
  0x44   : > { %vm214_vm1 = vcmp.ne.s32.totalorder %v213_v27, 0  ;;  %p443_p10 = scmp.lt.s32.totalorder %s441_s25, %s435_s18 }
  0x46   : > { %166 = vrot.lane.b32.xlu1 %v146_v2, %s650_s4  ;;  %162 = vrot.lane.b32.xlu0 %v142_v3, %s650_s4  ;;  %p444_p0 = por %p443_p10, %p442_p8 }
  0x48   : > { %p445_p2 = pnand %p444_p0, %p438_p13 }
  0x4a   : > { %170 = vrot.lane.b32.xlu1 %v150_v4, %s650_s4  ;;  %168 = vrot.lane.b32.xlu0 %v148_v5, %s650_s4 }
  0x4e   : > { %174 = vrot.lane.b32.xlu1 %v154_v6, %s650_s4  ;;  %172 = vrot.lane.b32.xlu0 %v152_v7, %s650_s4 }
  0x52   : > { %178 = vrot.lane.b32.xlu1 %v143_v8, %s650_s4  ;;  %176 = vrot.lane.b32.xlu0 %v141_v9, %s650_s4 }
  0x56   : > { %182 = vrot.lane.b32.xlu1 %v147_v10, %s650_s4  ;;  %180 = vrot.lane.b32.xlu0 %v145_v11, %s650_s4 }
  0x5a   : > { %186 = vrot.lane.b32.xlu1 %v151_v12, %s650_s4  ;;  %184 = vrot.lane.b32.xlu0 %v149_v13, %s650_s4 }
  0x5e   : > { %190 = vrot.lane.b32.xlu1 %v155_v14, %s650_s4  ;;  %188 = vrot.lane.b32.xlu0 %v153_v15, %s650_s4 }
  0xb4   : > { %v165_v16 = vpop.permute.xlu1 %164  ;;  %v161_v17 = vpop.permute.xlu0 %160 }
  0xb8   : > { %v167_v18 = vpop.permute.xlu1 %166  ;;  %v163_v19 = vpop.permute.xlu0 %162 }
  0xbc   : > { %v171_v21 = vpop.permute.xlu1 %170  ;;  %v169_v22 = vpop.permute.xlu0 %168 }
  0xc0   : > { %v175_v25 = vpop.permute.xlu1 %174  ;;  %v173_v26 = vpop.permute.xlu0 %172 }
  0xc4   : > { %v179_v29 = vpop.permute.xlu1 %178  ;;  %v177_v30 = vpop.permute.xlu0 %176 }
  0xc5   : > { %v197_v31 = vsel %vm685_vm0, %v163_v19, %v179_v29  ;;  %v205_v32 = vsel %vm685_vm0, %v179_v29, %v163_v19  ;;  %v196_v33 = vsel %vm685_vm0, %v161_v17, %v177_v30  ;;  %v204_v34 = vsel %vm685_vm0, %v177_v30, %v161_v17 }
  0xc6   : > { %v217_v35 = vsel %vm214_vm1, %v197_v31, %v205_v32  ;;  %v218_v36 = vsel %vm214_vm1, %v205_v32, %v197_v31  ;;  %v215_v37 = vsel %vm214_vm1, %v196_v33, %v204_v34  ;;  %v216_v38 = vsel %vm214_vm1, %v204_v34, %v196_v33 }
  0xc7   : > { %233 = vst [vmem:[%s703_s7 + $0x10] sm:$0xff] %v217_v35  ;;  %234 = vst [vmem:[%s703_s7 + $0x18] sm:$0xff] %v218_v36 }
  0xc8   : > { %231 = vst [vmem:[%s703_s7] sm:$0xff] %v215_v37  ;;  %232 = vst [vmem:[%s703_s7 + $0x8] sm:$0xff] %v216_v38  ;;  %v183_v39 = vpop.permute.xlu1 %182  ;;  %v181_v40 = vpop.permute.xlu0 %180 }
  0xc9   : > { %v199_v41 = vsel %vm685_vm0, %v167_v18, %v183_v39  ;;  %v207_v42 = vsel %vm685_vm0, %v183_v39, %v167_v18  ;;  %v198_v43 = vsel %vm685_vm0, %v165_v16, %v181_v40  ;;  %v206_v44 = vsel %vm685_vm0, %v181_v40, %v165_v16 }
  0xca   : > { %v221_v45 = vsel %vm214_vm1, %v199_v41, %v207_v42  ;;  %v222_v46 = vsel %vm214_vm1, %v207_v42, %v199_v41  ;;  %v219_v47 = vsel %vm214_vm1, %v198_v43, %v206_v44  ;;  %v220_v48 = vsel %vm214_vm1, %v206_v44, %v198_v43 }
  0xcb   : > { %237 = vst [vmem:[%s703_s7 + $0x30] sm:$0xff] %v221_v45  ;;  %238 = vst [vmem:[%s703_s7 + $0x38] sm:$0xff] %v222_v46 }
  0xcc   : > { %235 = vst [vmem:[%s703_s7 + $0x20] sm:$0xff] %v219_v47  ;;  %236 = vst [vmem:[%s703_s7 + $0x28] sm:$0xff] %v220_v48  ;;  %v187_v49 = vpop.permute.xlu1 %186  ;;  %v185_v50 = vpop.permute.xlu0 %184 }
  0xcd   : > { %v201_v51 = vsel %vm685_vm0, %v171_v21, %v187_v49  ;;  %v209_v52 = vsel %vm685_vm0, %v187_v49, %v171_v21  ;;  %v200_v53 = vsel %vm685_vm0, %v169_v22, %v185_v50  ;;  %v208_v54 = vsel %vm685_vm0, %v185_v50, %v169_v22 }
  0xce   : > { %v225_v55 = vsel %vm214_vm1, %v201_v51, %v209_v52  ;;  %v226_v56 = vsel %vm214_vm1, %v209_v52, %v201_v51  ;;  %v223_v57 = vsel %vm214_vm1, %v200_v53, %v208_v54  ;;  %v224_v58 = vsel %vm214_vm1, %v208_v54, %v200_v53 }
  0xcf   : > { %241 = vst [vmem:[%s703_s7 + $0x50] sm:$0xff] %v225_v55  ;;  %242 = vst [vmem:[%s703_s7 + $0x58] sm:$0xff] %v226_v56 }
  0xd0   : > { %239 = vst [vmem:[%s703_s7 + $0x40] sm:$0xff] %v223_v57  ;;  %240 = vst [vmem:[%s703_s7 + $0x48] sm:$0xff] %v224_v58  ;;  %v191_v59 = vpop.permute.xlu1 %190  ;;  %v189_v60 = vpop.permute.xlu0 %188 }
  0xd1   : > { %v203_v61 = vsel %vm685_vm0, %v175_v25, %v191_v59  ;;  %v211_v62 = vsel %vm685_vm0, %v191_v59, %v175_v25  ;;  %v202_v63 = vsel %vm685_vm0, %v173_v26, %v189_v60  ;;  %v210_v0 = vsel %vm685_vm0, %v189_v60, %v173_v26 }
  0xd2   : > { %v229_v1 = vsel %vm214_vm1, %v203_v61, %v211_v62  ;;  %v230_v2 = vsel %vm214_vm1, %v211_v62, %v203_v61  ;;  %v227_v3 = vsel %vm214_vm1, %v202_v63, %v210_v0  ;;  %v228_v4 = vsel %vm214_vm1, %v210_v0, %v202_v63 }
  0xd3   : > { %245 = vst [vmem:[%s703_s7 + $0x70] sm:$0xff] %v229_v1  ;;  %246 = vst [vmem:[%s703_s7 + $0x78] sm:$0xff] %v230_v2 }
  0xd4   : > { %243 = vst [vmem:[%s703_s7 + $0x60] sm:$0xff] %v227_v3  ;;  %244 = vst [vmem:[%s703_s7 + $0x68] sm:$0xff] %v228_v4 }
  0xd5   : > { %448 = shalt.err (!%p445_p2)
}
  0xd6   : > { %s449_s26 = scalar_lea.hbm %s746_s15, 2048  ;;  %s453_s6 = scalar_lea.hbm %s810_s2, 4096 }
  0xd7   : > { %p450_p4 = scmp.ne.s32.totalorder %s746_s15, %s449_s26  ;;  %p454_p9 = scmp.lt.u32.totalorder %s746_s15, %s810_s2 }
  0xd8   : > { %p455_p1 = scmp.lt.u32.totalorder %s453_s6, %s449_s26  ;;  %p457_p6 = scmp.lt.u32.totalorder %s449_s26, %s746_s15 }
  0xd9   : > { %p451_p5 = pnand %p450_p4, %p819_p11 }
  0xda   : > { %p456_p3 = por %p455_p1, %p454_p9 }
  0xdb   : > { %p452_p7 = pneg %p451_p5 }
  0xdc   : > { %p458_p12 = por %p457_p6, %p456_p3 }
  0xde   : > { %p459_p13 = pnand %p458_p12, %p452_p7 }
  0xe0   : > { %462 = shalt.err (!%p459_p13)
}
  0xe1   : > { %s507_s4 = smov 256   ;;  %s508_s21 = smov 16  }
  0xe2   : > { %357 = dma.vmem_to_hbm [thread:$0]  (%p819_p11), %s748_s9, 2048, %s746_s15, %s248_s17, %s507_s4, %s507_s4, %s508_s21  }
  0xe3 PF: > { %s277_s5 = sand.u32 1, %s489_s11   ;;  %p820_p8 = scmp.ne.s32.totalorder %s815_s23, 0 }
  0xe4   : > { %p821_p10 = scmp.ge.s32.totalorder %s501_s14, 2  ;;  %s278_s7 = scalar_lea.sflag [#allocation6], %s277_s5 }
  0xe6   : > { %p364_p0 = pnand %p821_p10, %p820_p8 }
  0xe8   : > { %484 = dma.done.wait (!%p364_p0), %s278_s7, 2048  }
  0xe9   : > { %486 = vsyncadd (!%p364_p0), %s278_s7, 4294965248  ;;  %p16_p2 = scmp.ge.s32.totalorder %s552_s16, 4   ;;  %s822_s11 = smov %s493_s12 }
  0xea   : > { %s823_s12 = smov %s497_s13  ;;  %s824_s13 = smov %s564_s19 }
  0xeb   : > { %s825_s14 = smov %s552_s16  ;;  %18 = sbr.rel (!%p16_p2) target bundleno = 7 (0x7), region = 69 }
  0xf2   :  { %283 = vsyncpa [#allocation5], 1 }
  0xf3   :  { %285 = vsyncpa [#allocation5 + $0x1], 1 }
  0xf4   :  { %286 = vsyncpa [#allocation6], 1 }
  0xf5   :  { %288 = vsyncpa [#allocation6 + $0x1], 1 }

</bundles_post_ra>
